<compile_context>
chip_gen: v5e
topology: v5e:2x2
jax: 0.10.0
libtpu: 0.0.40
codegen_flags: <defaults>
</compile_context>

<pallas_src>
import functools

import jax
import jax.numpy as jnp
from jax import lax
from jax.experimental import pallas as pl
from jax.experimental.pallas import tpu as pltpu


def _focal_loss_kernel(x_ref, t_ref, wt_ref, out_ref, *, gamma):
    # x_ref : (TILE_N, C)  logits (f32 or bf16)
    # t_ref : (TILE_N, 1)  int32 target class per row
    # wt_ref: (TILE_N, 1)  f32 weights[target] per row (0 for padded rows)
    # out   : (TILE_N, 1)  f32 per-row focal loss
    x = x_ref[...].astype(jnp.float32)                 # (T, C)
    t = t_ref[...]                                     # (T, 1) int32
    w_t = wt_ref[...]                                  # (T, 1) f32

    n, c = x.shape
    col = lax.broadcasted_iota(jnp.int32, (n, c), 1)
    onehot = col == t                                  # (T, C) bool

    # Numerically stable log-softmax pieces, gathered only at the target col.
    m = jnp.max(x, axis=1, keepdims=True)              # (T, 1)   XLU reduce #1
    sh = x - m                                         # (T, C)
    sumexp = jnp.sum(jnp.exp(sh), axis=1, keepdims=True)  # (T,1)  exp over (T,C), XLU reduce #2
    lse = jnp.log(sumexp)                              # (T, 1)
    sh_t = jnp.sum(jnp.where(onehot, sh, 0.0),
                   axis=1, keepdims=True)              # (T, 1)   XLU reduce #3
    logp_t = sh_t - lse                                # (T, 1)
    p_t = jnp.exp(logp_t)                              # (T, 1)  (tiny EUP work)

    ce = -w_t * logp_t                                 # weighted CE per row
    one_minus_p = 1.0 - p_t
    if isinstance(gamma, int) and gamma >= 0:
        modulator = lax.integer_pow(one_minus_p, gamma)
    else:
        modulator = one_minus_p ** jnp.float32(gamma)

    out_ref[...] = modulator * ce                      # (T, 1) f32


def _choose_tile_n(n, c, itemsize):
    """Pick a row tile so one logits buffer stays ~<= 4 MiB (x2 double-buffer
    keeps us well inside every generation's scoped VMEM, incl. v7x 64 MiB)."""
    target_bytes = 4 * 1024 * 1024
    tile = target_bytes // max(1, c * itemsize)
    tile = max(8, min(1024, tile))
    tile = (tile // 8) * 8
    n_pad8 = ((n + 7) // 8) * 8
    tile = min(tile, n_pad8)
    return max(8, (tile // 8) * 8)


def focal_loss(outputs, targets, weights=None, gamma=2, reduction="mean"):
    """Pallas TPU implementation of FocalLoss.forward.

    outputs: (N, C) float logits (f32 or bf16)
    targets: (N,)   int class indices
    weights: optional (C,) float class weights
    """
    n, c = outputs.shape

    x = outputs
    if not jnp.issubdtype(x.dtype, jnp.floating):
        x = x.astype(jnp.float32)

    t = targets.astype(jnp.int32)
    if weights is None:
        w_t = jnp.ones((n,), dtype=jnp.float32)
    else:
        w_t = jnp.asarray(weights, dtype=jnp.float32)[t]   # cheap XLA gather

    # TODO(synk): for vocab-scale C (>= ~16k classes) add a class-axis grid with
    # online-softmax accumulators instead of holding a full (TILE_N, C) slab.
    tile_n = _choose_tile_n(n, c, x.dtype.itemsize)
    n_pad = ((n + tile_n - 1) // tile_n) * tile_n
    if n_pad != n:
        pad = n_pad - n
        x = jnp.pad(x, ((0, pad), (0, 0)))
        t = jnp.pad(t, (0, pad))          # padded target 0 is harmless:
        w_t = jnp.pad(w_t, (0, pad))      # padded weight 0 zeroes the row loss

    t2 = t.reshape(n_pad, 1)
    w2 = w_t.reshape(n_pad, 1).astype(jnp.float32)

    grid = (n_pad // tile_n,)
    kernel = functools.partial(_focal_loss_kernel, gamma=gamma)

    per_row = pl.pallas_call(
        kernel,
        out_shape=jax.ShapeDtypeStruct((n_pad, 1), jnp.float32),
        grid=grid,
        in_specs=[
            pl.BlockSpec((tile_n, c), lambda i: (i, 0)),   # logits tile
            pl.BlockSpec((tile_n, 1), lambda i: (i, 0)),   # targets column
            pl.BlockSpec((tile_n, 1), lambda i: (i, 0)),   # weights[target] column
        ],
        out_specs=pl.BlockSpec((tile_n, 1), lambda i: (i, 0)),
        compiler_params=pltpu.CompilerParams(
            dimension_semantics=("parallel",),             # megacore-shardable
        ),
    )(x, t2, w2)

    focal = per_row[:n, 0]
    if reduction == "mean":
        return jnp.sum(focal) / jnp.float32(n)
    elif reduction == "sum":
        return jnp.sum(focal)
    else:  # 'none'
        return focal


if __name__ == "__main__":
    key = jax.random.PRNGKey(0)
    k1, k2 = jax.random.split(key)

    N, C = 8, 32  # small shapes: batch=8 samples, 32 classes
    outputs = jax.random.normal(k1, (N, C), dtype=jnp.float32)
    targets = jax.random.randint(k2, (N,), 0, C, dtype=jnp.int32)
    weights = jnp.linspace(0.5, 1.5, C, dtype=jnp.float32)

    # Pure-JAX reference.
    logp_ref = jax.nn.log_softmax(outputs, axis=1)
    p_ref = jnp.exp(logp_ref)
    lp_t = logp_ref[jnp.arange(N), targets]
    p_t = p_ref[jnp.arange(N), targets]

    # Case 1: weighted, reduction='mean', gamma=2.
    loss = focal_loss(outputs, targets, weights=weights, gamma=2, reduction="mean")
    loss = jax.block_until_ready(loss)
    ce_ref = -weights[targets] * lp_t
    ref = jnp.mean(((1.0 - p_t) ** 2) * ce_ref)
    assert jnp.allclose(loss, ref, rtol=1e-5, atol=1e-5), (loss, ref)

    # Case 2: unweighted, reduction='none', gamma=2.
    per_row = focal_loss(outputs, targets, weights=None, gamma=2, reduction="none")
    per_row = jax.block_until_ready(per_row)
    ref_none = ((1.0 - p_t) ** 2) * (-lp_t)
    assert jnp.allclose(per_row, ref_none, rtol=1e-5, atol=1e-5), (per_row, ref_none)

    print("KERNEL_OK")
</pallas_src>

<mosaic_0001>
module attributes {stable_mosaic.version = 11 : i64} {
  func.func @_focal_loss_kernel(%arg0: i32, %arg1: memref<8x32xf32, #tpu.memory_space<vmem>>, %arg2: memref<8x1xi32, #tpu.memory_space<vmem>>, %arg3: memref<8x1xf32, #tpu.memory_space<vmem>>, %arg4: memref<8x1xf32, #tpu.memory_space<vmem>>) attributes {dimension_semantics = [#tpu.dimension_semantics<parallel>], iteration_bounds = array<i64: 1>, scalar_prefetch = 0 : i64, scratch_operands = 0 : i64, tpu.core_type = #tpu.core_type<tc>, window_params = [{transform_indices = @transform_0, window_bounds = array<i64: 8, 32>}, {transform_indices = @transform_1, window_bounds = array<i64: 8, 1>}, {transform_indices = @transform_2, window_bounds = array<i64: 8, 1>}, {transform_indices = @transform_3, window_bounds = array<i64: 8, 1>}]} {
    %c0 = arith.constant 0 : index
    %c0_0 = arith.constant 0 : index
    %0 = vector.load %arg1[%c0, %c0_0] : memref<8x32xf32, #tpu.memory_space<vmem>>, vector<8x32xf32>
    %c0_1 = arith.constant 0 : index
    %c0_2 = arith.constant 0 : index
    %1 = vector.load %arg2[%c0_1, %c0_2] : memref<8x1xi32, #tpu.memory_space<vmem>>, vector<8x1xi32>
    %c0_3 = arith.constant 0 : index
    %c0_4 = arith.constant 0 : index
    %2 = vector.load %arg3[%c0_3, %c0_4] : memref<8x1xf32, #tpu.memory_space<vmem>>, vector<8x1xf32>
    %3 = tpu.iota {dimensions = array<i32: 1>} : vector<8x32xi32>
    %4 = vector.broadcast %1 : vector<8x1xi32> to vector<8x32xi32>
    %5 = arith.cmpi eq, %3, %4 : vector<8x32xi32>
    %cst = arith.constant dense<0xFF800000> : vector<8xf32>
    %6 = vector.multi_reduction <maximumf>, %0, %cst [1] : vector<8x32xf32> to vector<8xf32>
    %7 = vector.shape_cast %6 : vector<8xf32> to vector<8x1xf32>
    %8 = vector.broadcast %7 : vector<8x1xf32> to vector<8x32xf32>
    %9 = arith.subf %0, %8 : vector<8x32xf32>
    %10 = math.exp %9 : vector<8x32xf32>
    %cst_5 = arith.constant dense<0.000000e+00> : vector<8xf32>
    %11 = vector.multi_reduction <add>, %10, %cst_5 [1] : vector<8x32xf32> to vector<8xf32>
    %12 = vector.shape_cast %11 : vector<8xf32> to vector<8x1xf32>
    %13 = math.log %12 : vector<8x1xf32>
    %cst_6 = arith.constant 0.000000e+00 : f32
    %14 = vector.broadcast %cst_6 : f32 to vector<8x32xf32>
    %15 = arith.select %5, %9, %14 : vector<8x32xi1>, vector<8x32xf32>
    %cst_7 = arith.constant dense<0.000000e+00> : vector<8xf32>
    %16 = vector.multi_reduction <add>, %15, %cst_7 [1] : vector<8x32xf32> to vector<8xf32>
    %17 = vector.shape_cast %16 : vector<8xf32> to vector<8x1xf32>
    %18 = arith.subf %17, %13 : vector<8x1xf32>
    %19 = math.exp %18 : vector<8x1xf32>
    %cst_8 = arith.constant 0.000000e+00 : f32
    %20 = vector.broadcast %cst_8 : f32 to vector<8x1xf32>
    %21 = arith.subf %20, %2 : vector<8x1xf32>
    %22 = arith.mulf %21, %18 : vector<8x1xf32>
    %cst_9 = arith.constant 1.000000e+00 : f32
    %23 = vector.broadcast %cst_9 : f32 to vector<8x1xf32>
    %24 = arith.subf %23, %19 : vector<8x1xf32>
    %25 = arith.mulf %24, %24 : vector<8x1xf32>
    %26 = arith.mulf %25, %22 : vector<8x1xf32>
    %c0_10 = arith.constant 0 : index
    %c0_11 = arith.constant 0 : index
    %27 = vector.load %arg4[%c0_10, %c0_11] : memref<8x1xf32, #tpu.memory_space<vmem>>, vector<8x1xf32>
    tpu.vector_store %arg4[%c0_10, %c0_11], %26 {strides = array<i32>} : memref<8x1xf32, #tpu.memory_space<vmem>>, vector<8x1xf32>,
    return
  }
  func.func @transform_0(%arg0: i32) -> (i32, i32) {
    %c0_i32 = arith.constant 0 : i32
    %c0_i32_0 = arith.constant 0 : i32
    return %arg0, %c0_i32 : i32, i32
  }
  func.func @transform_1(%arg0: i32) -> (i32, i32) {
    %c0_i32 = arith.constant 0 : i32
    %c0_i32_0 = arith.constant 0 : i32
    return %arg0, %c0_i32 : i32, i32
  }
  func.func @transform_2(%arg0: i32) -> (i32, i32) {
    %c0_i32 = arith.constant 0 : i32
    %c0_i32_0 = arith.constant 0 : i32
    return %arg0, %c0_i32 : i32, i32
  }
  func.func @transform_3(%arg0: i32) -> (i32, i32) {
    %c0_i32 = arith.constant 0 : i32
    %c0_i32_0 = arith.constant 0 : i32
    return %arg0, %c0_i32 : i32, i32
  }
}

</mosaic_0001>

<bundles_post_ra>
// kernel: tpu_custom_call.1
= control target key start
LH: loop header
LB: loop body
LE: loop exit
PB: predicated region body
PF: predicated region fallthrough
CT: control target
= control target key end

     0   :  { %vm23_vm0 = vcmask 261120   ;;  %v61_v1 = vmov 0   ;;  %v17_v9 = vlaneseq  ;;  %vm47_vm2 = vcmask 7168   ;;  %s97_s0 = inlined_call_operand.vmem [shape: f32[8,32], index: 0, kind: input, shape index: {}]   ;;  %s98_s1 = inlined_call_operand.vmem [shape: s32[8,1], index: 1, kind: input, shape index: {}]   ;;  %s99_s2 = inlined_call_operand.vmem [shape: f32[8,1], index: 2, kind: input, shape index: {}]   ;;  %s100_s3 = inlined_call_operand.vmem [shape: f32[8,1], index: 3, kind: output, shape index: {}]  }
   0x1   :  { %v14_v0 = vld [vmem:[%s97_s0] sm:$0xff]  ;;  %54 = vset.pattern.permute.xlu0 %v61_v1 }
   0x2   :  { %v24_v2 = vsel %vm23_vm0, %v14_v0, -inf  ;;  %v15_v3 = vld [vmem:[%s98_s1] sm:$0xff]  ;;  %v18_v10 = vand.u32 127, %v17_v9 }
   0x3   :  { %25 = vmax.xlane.f32.xlu0 %v24_v2  ;;  %v16_v20 = vld [vmem:[%s99_s2] sm:$0xff] }
   0x4   :  { %v42_v21 = vsub.f32 0.0, %v16_v20 }
  0x17   :  { %20 = vperm.xlu0 %54, %v15_v3  }
  0x76   :  { %v26_v4 = vpop.xlane.xlu0 %25 }
  0x77   :  { %v27_v5 = vsub.f32 %v14_v0, %v26_v4 }
  0x79   :  { %v28_v6 = vmul.f32 1.442695, %v27_v5 }
  0x7b   :  { %55 = vpow2.f32 %v28_v6 }
  0x81   :  { %v56_v7 = vpop.eup %55 }
  0x82   :  { %v30_v8 = vsel %vm23_vm0, %v56_v7, 0.0 }
  0x83   :  { %31 = vadd.xlane.f32.xlu1 %v30_v8 }
  0x89   :  { %v21_v11 = vpop.permute.xlu0 %20 }
  0x8a   :  { %vm22_vm1 = vcmp.eq.s32.totalorder %v18_v10, %v21_v11 }
  0x8b   :  { %v35_v12 = vsel %vm22_vm1, %v27_v5, 0.0 }
  0x8c   :  { %v36_v13 = vsel %vm23_vm0, %v35_v12, 0.0 }
  0x8d   :  { %37 = vadd.xlane.f32.xlu1 %v36_v13 }
  0xf6   :  { %v32_v14 = vpop.xlane.xlu1 %31 }
  0xf7   :  { %57 = vlog2.f32 %v32_v14 }
  0xfd   :  { %v58_v15 = vpop.eup %57 }
  0xfe   :  { %v34_v16 = vmul.f32 0.6931472, %v58_v15 }
 0x100   :  { %v38_v17 = vpop.xlane.xlu1 %37 }
 0x101   :  { %v39_v18 = vsub.f32 %v38_v17, %v34_v16 }
 0x103   :  { %v40_v19 = vmul.f32 1.442695, %v39_v18  ;;  %v43_v24 = vmul.f32 %v42_v21, %v39_v18 }
 0x105   :  { %59 = vpow2.f32 %v40_v19 }
 0x10b   :  { %v60_v22 = vpop.eup %59 }
 0x10c   :  { %v44_v23 = vsub.f32 1.0, %v60_v22 }
 0x10e   :  { %v45_v25 = vmul.f32 %v44_v23, %v44_v23 }
 0x110   :  { %v46_v26 = vmul.f32 %v45_v25, %v43_v24 }
 0x112   :  { %48 = vst.msk [vmem:[%s100_s3] sm:$0xff] %vm47_vm2, %v46_v26 }

</bundles_post_ra>
